<compile_context>
chip_gen: v5e
topology: v5e:2x2
jax: 0.10.0
libtpu: 0.0.40
codegen_flags: <defaults>
</compile_context>

<pallas_src>
import jax
import jax.numpy as jnp
from jax.experimental import pallas as pl
from jax.experimental.pallas import tpu as pltpu


def _make_zero_mean_kernel(bpb, cin, hw):
    """Builds the kernel for a block of `bpb` samples, Cin=cin, spatial=hw."""
    inv_hw = 1.0 / float(hw)

    def kernel(x_ref, w_ref, b_ref, o_ref):
        # x_ref: (bpb, Cin, HW)  w_ref: (Cout, Cin)  b_ref: (Cout, 1)
        # o_ref: (bpb, Cout, HW)
        w = w_ref[...]         # (Cout, Cin)  -- tiny, loaded once per block
        bias = b_ref[...]      # (Cout, 1)
        for b in range(bpb):   # static unroll over samples in this block
            x = x_ref[b]       # (Cin, HW) -- free view (leading dim untiled)
            # 1x1 conv as Cin broadcast (Cout,1)*(1,HW) FMAs on (Cout, HW) vregs.
            y = w[:, 0:1] * x[0:1, :]
            for ci in range(1, cin):
                y = y + w[:, ci : ci + 1] * x[ci : ci + 1, :]
            y = y + bias                                         # lane broadcast
            # Per-channel spatial mean: cross-lane reduce (XLU) + const 1/HW mul.
            mean = jnp.sum(y, axis=-1, keepdims=True) * inv_hw   # (Cout, 1)
            o_ref[b] = (y - mean).astype(o_ref.dtype)

    return kernel


def _tensorcores_per_chip():
    # v7x exposes 2 TensorCores per chip (grid axes marked "parallel" shard
    # across them); v5e / v6e have a single TC.  Both paths are correct anywhere.
    try:
        kind = jax.devices()[0].device_kind.lower()
    except Exception:
        return 1
    return 2 if "7" in kind else 1


def zero_mean_model_pallas(x_nchw, weight, bias):
    """x_nchw: (N, Cin, H, W) f32; weight: (Cout, Cin) f32; bias: (Cout,) f32."""
    N, Cin, H, W = x_nchw.shape
    Cout = weight.shape[0]
    HW = H * W

    # Free reshapes only (no transposes): NCHW -> (N, Cin, HW); bias -> (Cout, 1).
    x_flat = x_nchw.reshape(N, Cin, HW)
    w = weight.astype(jnp.float32)                 # (Cout, Cin), used as-is
    b = bias.reshape(Cout, 1).astype(jnp.float32)  # channel-major bias tile

    # Single-TC (v5e/v6e): one grid step for the whole batch (avoids ~0.35us of
    # per-step pipeline overhead on a ~24 KiB problem).
    # Dual-TC (v7x): one sample per grid step, sharded across the 2 cores.
    n_blocks = N if (_tensorcores_per_chip() > 1 and N > 1) else 1
    bpb = N // n_blocks

    # VMEM per grid step ~= 2 * bpb * (Cin + Cout) * HW * 4 B (double-buffered)
    # -> ~24 KiB at these shapes; far under the explicit limit below.
    # TODO(synk): for production resolutions where HW*(Cin+Cout)*bpb*8*4B nears
    # the VMEM limit (64 MiB on v7x), add an HW grid axis with a two-pass mean
    # (sum-accumulate scratch, then subtract) instead of the single-block mean.

    out_flat = pl.pallas_call(
        _make_zero_mean_kernel(bpb, Cin, HW),
        out_shape=jax.ShapeDtypeStruct((N, Cout, HW), jnp.float32),
        grid_spec=pltpu.PrefetchScalarGridSpec(
            num_scalar_prefetch=0,
            grid=(n_blocks,),
            in_specs=[
                pl.BlockSpec((bpb, Cin, HW), lambda i: (i, 0, 0)),
                pl.BlockSpec((Cout, Cin), lambda i: (0, 0)),
                pl.BlockSpec((Cout, 1), lambda i: (0, 0)),
            ],
            out_specs=pl.BlockSpec((bpb, Cout, HW), lambda i: (i, 0, 0)),
        ),
        compiler_params=pltpu.CompilerParams(
            dimension_semantics=("parallel",),
            vmem_limit_bytes=32 * 1024 * 1024,
        ),
    )(x_flat, w, b)

    # (N, Cout, HW) -> NCHW: free reshape, no transpose.
    return out_flat.reshape(N, Cout, H, W)


def _reference(x_nchw, weight, bias):
    # Pure-JAX reference of the same semantics (1x1 conv + zero-mean over dims 2..).
    y = jnp.einsum("nchw,oc->nohw", x_nchw, weight) + bias[None, :, None, None]
    mean = jnp.mean(y, axis=(2, 3), keepdims=True)
    return y - mean


if __name__ == "__main__":
    key = jax.random.PRNGKey(0)
    kx, kw, kb = jax.random.split(key, 3)

    N, Cin, H, W, Cout = 2, 4, 16, 16, 8
    x = jax.random.normal(kx, (N, Cin, H, W), dtype=jnp.float32)
    # Deterministic PyTorch-like uniform init for Conv2d(4, 8, kernel_size=1)
    bound = 1.0 / (Cin ** 0.5)
    weight = jax.random.uniform(kw, (Cout, Cin), minval=-bound, maxval=bound,
                                dtype=jnp.float32)
    bias = jax.random.uniform(kb, (Cout,), minval=-bound, maxval=bound,
                              dtype=jnp.float32)

    out = jax.block_until_ready(zero_mean_model_pallas(x, weight, bias))
    ref = _reference(x, weight, bias)

    assert out.shape == (N, Cout, H, W)
    assert jnp.allclose(out, ref, atol=1e-5, rtol=1e-5)
    # zero-mean property over spatial dims
    assert jnp.allclose(jnp.mean(out, axis=(2, 3)), 0.0, atol=1e-5)
    print("KERNEL_OK")
</pallas_src>

<mosaic_0001>
module attributes {stable_mosaic.version = 11 : i64} {
  func.func @kernel(%arg0: i32, %arg1: memref<2x4x256xf32, #tpu.memory_space<vmem>>, %arg2: memref<8x4xf32, #tpu.memory_space<vmem>>, %arg3: memref<8x1xf32, #tpu.memory_space<vmem>>, %arg4: memref<2x8x256xf32, #tpu.memory_space<vmem>>) attributes {dimension_semantics = [#tpu.dimension_semantics<parallel>], iteration_bounds = array<i64: 1>, scalar_prefetch = 0 : i64, scratch_operands = 0 : i64, tpu.core_type = #tpu.core_type<tc>, window_params = [{transform_indices = @transform_0, window_bounds = array<i64: 2, 4, 256>}, {pipeline_mode = #tpu.pipeline_mode<synchronous>, transform_indices = @transform_1, window_bounds = array<i64: 8, 4>}, {pipeline_mode = #tpu.pipeline_mode<synchronous>, transform_indices = @transform_2, window_bounds = array<i64: 8, 1>}, {transform_indices = @transform_3, window_bounds = array<i64: 2, 8, 256>}]} {
    %c0 = arith.constant 0 : index
    %c0_0 = arith.constant 0 : index
    %0 = vector.load %arg2[%c0, %c0_0] : memref<8x4xf32, #tpu.memory_space<vmem>>, vector<8x4xf32>
    %c0_1 = arith.constant 0 : index
    %c0_2 = arith.constant 0 : index
    %1 = vector.load %arg3[%c0_1, %c0_2] : memref<8x1xf32, #tpu.memory_space<vmem>>, vector<8x1xf32>
    %c0_3 = arith.constant 0 : index
    %c0_4 = arith.constant 0 : index
    %c0_5 = arith.constant 0 : index
    %2 = vector.load %arg1[%c0_3, %c0_4, %c0_5] : memref<2x4x256xf32, #tpu.memory_space<vmem>>, vector<1x4x256xf32>
    %3 = vector.shape_cast %2 : vector<1x4x256xf32> to vector<4x256xf32>
    %4 = vector.extract_strided_slice %0 {offsets = [0, 0], sizes = [8, 1], strides = [1, 1]} : vector<8x4xf32> to vector<8x1xf32>
    %5 = vector.extract_strided_slice %3 {offsets = [0, 0], sizes = [1, 256], strides = [1, 1]} : vector<4x256xf32> to vector<1x256xf32>
    %6 = vector.broadcast %4 : vector<8x1xf32> to vector<8x256xf32>
    %7 = vector.broadcast %5 : vector<1x256xf32> to vector<8x256xf32>
    %8 = arith.mulf %6, %7 : vector<8x256xf32>
    %9 = vector.extract_strided_slice %0 {offsets = [0, 1], sizes = [8, 1], strides = [1, 1]} : vector<8x4xf32> to vector<8x1xf32>
    %10 = vector.extract_strided_slice %3 {offsets = [1, 0], sizes = [1, 256], strides = [1, 1]} : vector<4x256xf32> to vector<1x256xf32>
    %11 = vector.broadcast %9 : vector<8x1xf32> to vector<8x256xf32>
    %12 = vector.broadcast %10 : vector<1x256xf32> to vector<8x256xf32>
    %13 = arith.mulf %11, %12 : vector<8x256xf32>
    %14 = arith.addf %8, %13 : vector<8x256xf32>
    %15 = vector.extract_strided_slice %0 {offsets = [0, 2], sizes = [8, 1], strides = [1, 1]} : vector<8x4xf32> to vector<8x1xf32>
    %16 = vector.extract_strided_slice %3 {offsets = [2, 0], sizes = [1, 256], strides = [1, 1]} : vector<4x256xf32> to vector<1x256xf32>
    %17 = vector.broadcast %15 : vector<8x1xf32> to vector<8x256xf32>
    %18 = vector.broadcast %16 : vector<1x256xf32> to vector<8x256xf32>
    %19 = arith.mulf %17, %18 : vector<8x256xf32>
    %20 = arith.addf %14, %19 : vector<8x256xf32>
    %21 = vector.extract_strided_slice %0 {offsets = [0, 3], sizes = [8, 1], strides = [1, 1]} : vector<8x4xf32> to vector<8x1xf32>
    %22 = vector.extract_strided_slice %3 {offsets = [3, 0], sizes = [1, 256], strides = [1, 1]} : vector<4x256xf32> to vector<1x256xf32>
    %23 = vector.broadcast %21 : vector<8x1xf32> to vector<8x256xf32>
    %24 = vector.broadcast %22 : vector<1x256xf32> to vector<8x256xf32>
    %25 = arith.mulf %23, %24 : vector<8x256xf32>
    %26 = arith.addf %20, %25 : vector<8x256xf32>
    %27 = vector.broadcast %1 : vector<8x1xf32> to vector<8x256xf32>
    %28 = arith.addf %26, %27 : vector<8x256xf32>
    %cst = arith.constant dense<0.000000e+00> : vector<8xf32>
    %29 = vector.multi_reduction <add>, %28, %cst [1] : vector<8x256xf32> to vector<8xf32>
    %30 = vector.shape_cast %29 : vector<8xf32> to vector<8x1xf32>
    %cst_6 = arith.constant 3.906250e-03 : f32
    %31 = vector.broadcast %cst_6 : f32 to vector<8x1xf32>
    %32 = arith.mulf %30, %31 : vector<8x1xf32>
    %33 = vector.broadcast %32 : vector<8x1xf32> to vector<8x256xf32>
    %34 = arith.subf %28, %33 : vector<8x256xf32>
    %c0_7 = arith.constant 0 : index
    %c0_8 = arith.constant 0 : index
    %c0_9 = arith.constant 0 : index
    %35 = vector.load %arg4[%c0_7, %c0_8, %c0_9] : memref<2x8x256xf32, #tpu.memory_space<vmem>>, vector<1x8x256xf32>
    %36 = vector.shape_cast %35 : vector<1x8x256xf32> to vector<8x256xf32>
    %37 = vector.shape_cast %34 : vector<8x256xf32> to vector<1x8x256xf32>
    tpu.vector_store %arg4[%c0_7, %c0_8, %c0_9], %37 {strides = array<i32>} : memref<2x8x256xf32, #tpu.memory_space<vmem>>, vector<1x8x256xf32>,
    %c1 = arith.constant 1 : index
    %c0_10 = arith.constant 0 : index
    %c0_11 = arith.constant 0 : index
    %38 = vector.load %arg1[%c1, %c0_10, %c0_11] : memref<2x4x256xf32, #tpu.memory_space<vmem>>, vector<1x4x256xf32>
    %39 = vector.shape_cast %38 : vector<1x4x256xf32> to vector<4x256xf32>
    %40 = vector.extract_strided_slice %0 {offsets = [0, 0], sizes = [8, 1], strides = [1, 1]} : vector<8x4xf32> to vector<8x1xf32>
    %41 = vector.extract_strided_slice %39 {offsets = [0, 0], sizes = [1, 256], strides = [1, 1]} : vector<4x256xf32> to vector<1x256xf32>
    %42 = vector.broadcast %40 : vector<8x1xf32> to vector<8x256xf32>
    %43 = vector.broadcast %41 : vector<1x256xf32> to vector<8x256xf32>
    %44 = arith.mulf %42, %43 : vector<8x256xf32>
    %45 = vector.extract_strided_slice %0 {offsets = [0, 1], sizes = [8, 1], strides = [1, 1]} : vector<8x4xf32> to vector<8x1xf32>
    %46 = vector.extract_strided_slice %39 {offsets = [1, 0], sizes = [1, 256], strides = [1, 1]} : vector<4x256xf32> to vector<1x256xf32>
    %47 = vector.broadcast %45 : vector<8x1xf32> to vector<8x256xf32>
    %48 = vector.broadcast %46 : vector<1x256xf32> to vector<8x256xf32>
    %49 = arith.mulf %47, %48 : vector<8x256xf32>
    %50 = arith.addf %44, %49 : vector<8x256xf32>
    %51 = vector.extract_strided_slice %0 {offsets = [0, 2], sizes = [8, 1], strides = [1, 1]} : vector<8x4xf32> to vector<8x1xf32>
    %52 = vector.extract_strided_slice %39 {offsets = [2, 0], sizes = [1, 256], strides = [1, 1]} : vector<4x256xf32> to vector<1x256xf32>
    %53 = vector.broadcast %51 : vector<8x1xf32> to vector<8x256xf32>
    %54 = vector.broadcast %52 : vector<1x256xf32> to vector<8x256xf32>
    %55 = arith.mulf %53, %54 : vector<8x256xf32>
    %56 = arith.addf %50, %55 : vector<8x256xf32>
    %57 = vector.extract_strided_slice %0 {offsets = [0, 3], sizes = [8, 1], strides = [1, 1]} : vector<8x4xf32> to vector<8x1xf32>
    %58 = vector.extract_strided_slice %39 {offsets = [3, 0], sizes = [1, 256], strides = [1, 1]} : vector<4x256xf32> to vector<1x256xf32>
    %59 = vector.broadcast %57 : vector<8x1xf32> to vector<8x256xf32>
    %60 = vector.broadcast %58 : vector<1x256xf32> to vector<8x256xf32>
    %61 = arith.mulf %59, %60 : vector<8x256xf32>
    %62 = arith.addf %56, %61 : vector<8x256xf32>
    %63 = vector.broadcast %1 : vector<8x1xf32> to vector<8x256xf32>
    %64 = arith.addf %62, %63 : vector<8x256xf32>
    %cst_12 = arith.constant dense<0.000000e+00> : vector<8xf32>
    %65 = vector.multi_reduction <add>, %64, %cst_12 [1] : vector<8x256xf32> to vector<8xf32>
    %66 = vector.shape_cast %65 : vector<8xf32> to vector<8x1xf32>
    %cst_13 = arith.constant 3.906250e-03 : f32
    %67 = vector.broadcast %cst_13 : f32 to vector<8x1xf32>
    %68 = arith.mulf %66, %67 : vector<8x1xf32>
    %69 = vector.broadcast %68 : vector<8x1xf32> to vector<8x256xf32>
    %70 = arith.subf %64, %69 : vector<8x256xf32>
    %c1_14 = arith.constant 1 : index
    %c0_15 = arith.constant 0 : index
    %c0_16 = arith.constant 0 : index
    %71 = vector.load %arg4[%c1_14, %c0_15, %c0_16] : memref<2x8x256xf32, #tpu.memory_space<vmem>>, vector<1x8x256xf32>
    %72 = vector.shape_cast %71 : vector<1x8x256xf32> to vector<8x256xf32>
    %73 = vector.shape_cast %70 : vector<8x256xf32> to vector<1x8x256xf32>
    tpu.vector_store %arg4[%c1_14, %c0_15, %c0_16], %73 {strides = array<i32>} : memref<2x8x256xf32, #tpu.memory_space<vmem>>, vector<1x8x256xf32>,
    return
  }
  func.func @transform_0(%arg0: i32) -> (i32, i32, i32) {
    %c0_i32 = arith.constant 0 : i32
    %c0_i32_0 = arith.constant 0 : i32
    %c0_i32_1 = arith.constant 0 : i32
    return %arg0, %c0_i32, %c0_i32_0 : i32, i32, i32
  }
  func.func @transform_1(%arg0: i32) -> (i32, i32) {
    %c0_i32 = arith.constant 0 : i32
    %c0_i32_0 = arith.constant 0 : i32
    %c0_i32_1 = arith.constant 0 : i32
    return %c0_i32, %c0_i32_0 : i32, i32
  }
  func.func @transform_2(%arg0: i32) -> (i32, i32) {
    %c0_i32 = arith.constant 0 : i32
    %c0_i32_0 = arith.constant 0 : i32
    %c0_i32_1 = arith.constant 0 : i32
    return %c0_i32, %c0_i32_0 : i32, i32
  }
  func.func @transform_3(%arg0: i32) -> (i32, i32, i32) {
    %c0_i32 = arith.constant 0 : i32
    %c0_i32_0 = arith.constant 0 : i32
    %c0_i32_1 = arith.constant 0 : i32
    return %arg0, %c0_i32, %c0_i32_0 : i32, i32, i32
  }
}

</mosaic_0001>

<bundles_post_ra>
// kernel: tpu_custom_call.1
= control target key start
LH: loop header
LB: loop body
LE: loop exit
PB: predicated region body
PF: predicated region fallthrough
CT: control target
= control target key end

     0   :  { %v199_v1 = vmov 0   ;;  %v200_v2 = vmov 2   ;;  %s241_s0 = inlined_call_operand.vmem [shape: f32[2,4,256], index: 0, kind: input, shape index: {}]   ;;  %s242_s1 = inlined_call_operand.vmem [shape: f32[8,4], index: 1, kind: input, shape index: {}]   ;;  %s243_s2 = inlined_call_operand.vmem [shape: f32[8,1], index: 2, kind: input, shape index: {}]   ;;  %s244_s3 = inlined_call_operand.hbm [shape: f32[2,8,256], index: 3, kind: output, shape index: {}]  }
   0x1   :  { %v15_v0 = vld [vmem:[%s242_s1] sm:$0xff]  ;;  %167 = vset.pattern.permute.xlu0 %v199_v1  ;;  %169 = vset.pattern.permute.xlu1 %v200_v2 }
   0x2   :  { %v16_v3 = vld [vmem:[%s243_s2] sm:$0xff] }
   0x3   :  { %8 = vsyncpa [#allocation3], 0  ;;  %20 = vperm.xlu0 %167, %v15_v0   ;;  %47 = vperm.xlu1 %169, %v15_v0   ;;  %v201_v4 = vmov 1   ;;  %v202_v5 = vmov 3   ;;  %v17_v6 = vld [vmem:[%s241_s0] sm:$0xff]  ;;  %v159_v7 = vld [vmem:[%s241_s0 + $0x8] sm:$0xff] }
   0x4   :  { %171 = vset.pattern.permute.xlu2 %v199_v1  ;;  %v24_v8 = vperm.slane %v17_v6, 0  ;;  %v25_v9 = vperm.slane %v17_v6, 4  ;;  %v92_v10 = vperm.slane %v159_v7, 0  ;;  %v93_v11 = vperm.slane %v159_v7, 4  ;;  %s203_s0 = smov [#allocation2]   ;;  %s147_s21 = sshll.u32 %s244_s3, 4  ;;  %s148_s21 = int_to_ptr.hbm [resolvable:$true] %s147_s21 }
   0x5   :  { %76 = vperm.xlu2 %171, %v16_v3   ;;  %v50_v14 = vperm.slane %v17_v6, 2  ;;  %v51_v15 = vperm.slane %v17_v6, 6  ;;  %v110_v16 = vperm.slane %v159_v7, 2  ;;  %v111_v17 = vperm.slane %v159_v7, 6  ;;  %s145_s2 = sshll.u32 %s203_s0, 4  ;;  %s204_s22 = smov 256   ;;  %s146_s2 = int_to_ptr.vmem [resolvable:$true] %s145_s2 }
   0x6   :  { %v36_v18 = vperm.slane %v17_v6, 1  ;;  %v37_v19 = vperm.slane %v17_v6, 5  ;;  %v100_v20 = vperm.slane %v159_v7, 1  ;;  %v101_v21 = vperm.slane %v159_v7, 5  ;;  %s205_s23 = smov 16  }
   0x7   :  { %v64_v22 = vperm.slane %v17_v6, 3  ;;  %v65_v23 = vperm.slane %v17_v6, 7  ;;  %v120_v24 = vperm.slane %v159_v7, 3  ;;  %v121_v25 = vperm.slane %v159_v7, 7 }
   0x8   :  { %v28_v26 = vperm.slane %v24_v8, 0  ;;  %v29_v27 = vperm.slane %v25_v9, 0  ;;  %v96_v28 = vperm.slane %v92_v10, 0  ;;  %v97_v29 = vperm.slane %v93_v11, 0 }
   0x9   :  { %v54_v30 = vperm.slane %v50_v14, 2  ;;  %v55_v31 = vperm.slane %v51_v15, 2  ;;  %v114_v32 = vperm.slane %v110_v16, 2  ;;  %v115_v33 = vperm.slane %v111_v17, 2 }
   0xa   :  { %v40_v34 = vperm.slane %v36_v18, 1  ;;  %v41_v35 = vperm.slane %v37_v19, 1  ;;  %v104_v36 = vperm.slane %v100_v20, 1  ;;  %v105_v37 = vperm.slane %v101_v21, 1 }
   0xb   :  { %168 = vset.pattern.permute.xlu0 %v201_v4  ;;  %170 = vset.pattern.permute.xlu1 %v202_v5  ;;  %v68_v38 = vperm.slane %v64_v22, 3  ;;  %v69_v39 = vperm.slane %v65_v23, 3  ;;  %v124_v40 = vperm.slane %v120_v24, 3  ;;  %v125_v41 = vperm.slane %v121_v25, 3 }
   0xc   :  { %33 = vperm.xlu0 %168, %v15_v0   ;;  %61 = vperm.xlu1 %170, %v15_v0  }
  0x14   :  { %172 = vset.pattern.permute.xlu0 %v199_v1 }
  0x5f   :  { %v77_v4 = vpop.permute.xlu2 %76 }
  0x75   :  { %v21_v12 = vpop.permute.xlu0 %20  ;;  %v48_v13 = vpop.permute.xlu1 %47 }
  0x76   :  { %v30_v42 = vmul.f32 %v28_v26, %v21_v12  ;;  %v31_v43 = vmul.f32 %v29_v27, %v21_v12  ;;  %v98_v44 = vmul.f32 %v96_v28, %v21_v12  ;;  %v99_v45 = vmul.f32 %v97_v29, %v21_v12 }
  0x77   :  { %v56_v46 = vmul.f32 %v54_v30, %v48_v13  ;;  %v57_v47 = vmul.f32 %v55_v31, %v48_v13  ;;  %v116_v48 = vmul.f32 %v114_v32, %v48_v13  ;;  %v117_v49 = vmul.f32 %v115_v33, %v48_v13 }
  0x7e   :  { %v34_v50 = vpop.permute.xlu0 %33  ;;  %v62_v51 = vpop.permute.xlu1 %61 }
  0x7f   :  { %v42_v52 = vmul.f32 %v40_v34, %v34_v50  ;;  %v43_v53 = vmul.f32 %v41_v35, %v34_v50  ;;  %v106_v54 = vmul.f32 %v104_v36, %v34_v50  ;;  %v107_v55 = vmul.f32 %v105_v37, %v34_v50 }
  0x80   :  { %v70_v56 = vmul.f32 %v68_v38, %v62_v51  ;;  %v71_v57 = vmul.f32 %v69_v39, %v62_v51  ;;  %v126_v58 = vmul.f32 %v124_v40, %v62_v51  ;;  %v127_v59 = vmul.f32 %v125_v41, %v62_v51 }
  0x81   :  { %v44_v60 = vadd.f32 %v42_v52, %v30_v42  ;;  %v45_v61 = vadd.f32 %v43_v53, %v31_v43  ;;  %v108_v62 = vadd.f32 %v106_v54, %v98_v44  ;;  %v109_v63 = vadd.f32 %v107_v55, %v99_v45 }
  0x83   :  { %v118_v0 = vadd.f32 %v116_v48, %v108_v62  ;;  %v119_v1 = vadd.f32 %v117_v49, %v109_v63  ;;  %v58_v2 = vadd.f32 %v56_v46, %v44_v60  ;;  %v59_v3 = vadd.f32 %v57_v47, %v45_v61 }
  0x85   :  { %v128_v5 = vadd.f32 %v126_v58, %v118_v0  ;;  %v129_v6 = vadd.f32 %v127_v59, %v119_v1  ;;  %v72_v7 = vadd.f32 %v70_v56, %v58_v2  ;;  %v73_v8 = vadd.f32 %v71_v57, %v59_v3 }
  0x87   :  { %v130_v9 = vadd.f32 %v128_v5, %v77_v4  ;;  %v131_v10 = vadd.f32 %v129_v6, %v77_v4  ;;  %v79_v11 = vadd.f32 %v77_v4, %v72_v7  ;;  %v80_v12 = vadd.f32 %v77_v4, %v73_v8 }
  0x89   :  { %v132_v13 = vadd.f32 %v131_v10, %v130_v9  ;;  %v81_v14 = vadd.f32 %v80_v12, %v79_v11 }
  0x8b   :  { %133 = vadd.xlane.f32.xlu1 %v132_v13  ;;  %82 = vadd.xlane.f32.xlu2 %v81_v14 }
  0xfe   :  { %v134_v15 = vpop.xlane.xlu1 %133  ;;  %v83_v16 = vpop.xlane.xlu2 %82 }
  0xff   :  { %v135_v17 = vmul.f32 0.00390625, %v134_v15  ;;  %v84_v18 = vmul.f32 0.00390625, %v83_v16 }
 0x101   :  { %v136_v19 = vsub.f32 %v130_v9, %v135_v17  ;;  %v137_v20 = vsub.f32 %v131_v10, %v135_v17  ;;  %v85_v21 = vsub.f32 %v79_v11, %v84_v18  ;;  %v86_v22 = vsub.f32 %v80_v12, %v84_v18 }
 0x103   :  { %139 = vst [vmem:[#allocation2 + $0x10] sm:$0xff] %v136_v19 }
 0x104   :  { %140 = vst [vmem:[#allocation2 + $0x18] sm:$0xff] %v137_v20 }
 0x105   :  { %87 = vst [vmem:[#allocation2] sm:$0xff] %v85_v21 }
 0x106   :  { %88 = vst [vmem:[#allocation2 + $0x8] sm:$0xff] %v86_v22 }
 0x107   :  { %153 = dma.vmem_to_hbm [thread:$0]  %s146_s2, 512, %s148_s21, [#allocation3], %s204_s22, %s204_s22, %s205_s23  }
 0x108   :  { %197 = dma.done.wait [#allocation3], 512  }
 0x109   :  { %198 = vsyncadd [#allocation3], 4294966784 }
 0x10a   :  { %158 = vsyncpa [#allocation3], 1 }

</bundles_post_ra>
